<compile_context>
chip_gen: v7x
topology: tpu7x:2x2x1
jax: 0.10.0
libtpu: 0.0.40
codegen_flags: <defaults>
</compile_context>

<pallas_src>
import math
import jax
import jax.numpy as jnp
from jax.experimental import pallas as pl
from jax.experimental.pallas import tpu as pltpu


def film_kernel(gb_ref, x_ref, o_ref):
    # gb_ref: (c_blk, 2) f32 -- column 0 = gain, column 1 = bias.
    # x_ref/o_ref: (c_blk, t_blk) in x dtype.
    gb = gb_ref[...]
    g = gb[:, 0:1]                                    # (c_blk, 1) f32
    b = gb[:, 1:2]                                    # (c_blk, 1) f32
    # Lane-axis broadcast FMA; computed in f32 (promotion), cast on store.
    o_ref[...] = (x_ref[...] * g + b).astype(o_ref.dtype)


def _chip_budget():
    """Per-generation (x_tile_bytes, vmem_limit_bytes)."""
    kind = ""
    try:
        kind = jax.devices()[0].device_kind.lower()
    except Exception:
        pass
    if "v7" in kind or "7x" in kind:
        # 3.2 TB/s HBM: 8 MiB tiles cut per-step overhead share ~2x; raise the
        # scoped VMEM limit above the 32 MiB default (64 MiB physical).
        return 8 << 20, 48 << 20
    if "v6" in kind:
        # ~85% roofline plateau at 4 MiB tiles; ~17 MiB double-buffered total
        # fits the 32 MiB default scoped VMEM -- no limit override needed.
        return 4 << 20, None
    # v5e (16 MiB default scoped VMEM) and unknown chips: 2 MiB tiles keep the
    # double-buffered footprint ~8 MiB; cost vs a larger tile is <7% there.
    return 2 << 20, None


def _pick_blocks(rows, T, itemsize, tile_bytes):
    """Choose (c_blk, t_blk) for x tiles of ~tile_bytes, dtype-aware sublanes."""
    tile_elems = max(1, tile_bytes // itemsize)
    sub = max(8, 32 // itemsize)           # 8 f32, 16 bf16, 32 int8/fp8

    # Lane (T) block: full T when modest, else a large multiple of 128.
    t_blk = T if T <= 2048 else 2048

    # Row block against the flattened B*C axis.
    c_budget = max(1, tile_elems // t_blk)
    if rows <= c_budget:
        c_blk = rows                        # full-dim block (always legal)
    else:
        c_blk = max(sub, (c_budget // sub) * sub)
    return c_blk, t_blk


def film(x, condition, wg, bg, wb, bb):
    """x: [B, C, T], condition: [B, Ccond], wg/wb: [Ccond, C], bg/bb: [C]."""
    B, C, T = x.shape

    # --- hoisted, fused projections (one MXU matmul in XLA), kept in f32 -----
    w_cat = jnp.concatenate([wg, wb], axis=1)                      # [Ccond, 2C]
    b_cat = jnp.concatenate([bg, bb], axis=0)                      # [2C]
    gb = jnp.dot(condition, w_cat,
                 preferred_element_type=jnp.float32) + b_cat       # [B, 2C] f32
    gain = gb[:, :C]                                               # [B, C] f32
    bias = gb[:, C:]                                               # [B, C] f32

    if T < 128:
        # Tiny lane width in NCT layout: masked stores + per-call overhead make
        # a custom kernel net-negative; let XLA fuse the elementwise op.
        return (x * gain[:, :, None] + bias[:, :, None]).astype(x.dtype)

    # --- flattened, tiled streaming kernel -----------------------------------
    rows = B * C
    x2 = x.reshape(rows, T)                                        # free merge
    gb2 = jnp.stack([gain.reshape(rows), bias.reshape(rows)], axis=-1)  # [rows,2]

    itemsize = jnp.dtype(x.dtype).itemsize
    tile_bytes, vmem_limit = _chip_budget()
    c_blk, t_blk = _pick_blocks(rows, T, itemsize, tile_bytes)
    grid = (pl.cdiv(rows, c_blk), pl.cdiv(T, t_blk))

    out2 = pl.pallas_call(
        film_kernel,
        out_shape=jax.ShapeDtypeStruct((rows, T), x.dtype),
        grid_spec=pltpu.PrefetchScalarGridSpec(
            num_scalar_prefetch=0,
            grid=grid,
            in_specs=[
                # gain|bias packed: only re-fetched when the row block changes.
                pl.BlockSpec((c_blk, 2), lambda r, t: (r, 0)),
                pl.BlockSpec((c_blk, t_blk), lambda r, t: (r, t)),
            ],
            out_specs=pl.BlockSpec((c_blk, t_blk), lambda r, t: (r, t)),
        ),
        compiler_params=pltpu.CompilerParams(
            dimension_semantics=("parallel", "parallel"),
            vmem_limit_bytes=vmem_limit),
    )(gb2, x2)
    return out2.reshape(B, C, T)


def xavier_uniform(key, fan_in, fan_out):
    # Matches nn.init.xavier_uniform_ bound; stored as [fan_in, fan_out]
    # (transpose of PyTorch's [out, in] weight) for direct cond @ W.
    bound = math.sqrt(6.0 / (fan_in + fan_out))
    return jax.random.uniform(key, (fan_in, fan_out), jnp.float32,
                              minval=-bound, maxval=bound)


if __name__ == "__main__":
    B, C, T = 2, 8, 256           # batch, in_channels, time (T>=128 -> kernel)
    Ccond = 32                    # condition_channels

    key = jax.random.PRNGKey(0)
    k_x, k_c, k_wg, k_wb = jax.random.split(key, 4)

    x = jax.random.normal(k_x, (B, C, T), jnp.float32)
    condition = jax.random.normal(k_c, (B, Ccond), jnp.float32)

    wg = xavier_uniform(k_wg, Ccond, C)        # gain.weight^T
    bg = jnp.ones((C,), jnp.float32)           # gain.bias = 1
    wb = xavier_uniform(k_wb, Ccond, C)        # bias.weight^T
    bb = jnp.zeros((C,), jnp.float32)          # bias.bias = 0

    out = jax.block_until_ready(film(x, condition, wg, bg, wb, bb))

    # Pure-JAX reference.
    gain_ref = condition @ wg + bg
    bias_ref = condition @ wb + bb
    ref = x * gain_ref[:, :, None] + bias_ref[:, :, None]
    assert jnp.allclose(out, ref, atol=1e-5, rtol=1e-5), "mismatch vs reference"

    # Small-T shapes take the XLA-fusion fallback; verify it as well.
    x_small = jax.random.normal(k_x, (B, C, 16), jnp.float32)
    out_small = jax.block_until_ready(film(x_small, condition, wg, bg, wb, bb))
    ref_small = x_small * gain_ref[:, :, None] + bias_ref[:, :, None]
    assert jnp.allclose(out_small, ref_small, atol=1e-5, rtol=1e-5), \
        "mismatch vs reference (small-T fallback)"

    print("KERNEL_OK")
</pallas_src>

<mosaic_0001>
module attributes {stable_mosaic.version = 11 : i64} {
  func.func @film_kernel(%arg0: i32, %arg1: i32, %arg2: memref<16x2xf32, #tpu.memory_space<vmem>>, %arg3: memref<16x256xf32, #tpu.memory_space<vmem>>, %arg4: memref<16x256xf32, #tpu.memory_space<vmem>>) attributes {dimension_semantics = [#tpu.dimension_semantics<parallel>, #tpu.dimension_semantics<parallel>], iteration_bounds = array<i64: 1, 1>, scalar_prefetch = 0 : i64, scratch_operands = 0 : i64, tpu.core_type = #tpu.core_type<tc>, window_params = [{transform_indices = @transform_0, window_bounds = array<i64: 16, 2>}, {transform_indices = @transform_1, window_bounds = array<i64: 16, 256>}, {transform_indices = @transform_2, window_bounds = array<i64: 16, 256>}]} {
    %c0 = arith.constant 0 : index
    %c0_0 = arith.constant 0 : index
    %0 = vector.load %arg2[%c0, %c0_0] : memref<16x2xf32, #tpu.memory_space<vmem>>, vector<16x2xf32>
    %1 = vector.extract_strided_slice %0 {offsets = [0, 0], sizes = [16, 1], strides = [1, 1]} : vector<16x2xf32> to vector<16x1xf32>
    %2 = vector.extract_strided_slice %0 {offsets = [0, 1], sizes = [16, 1], strides = [1, 1]} : vector<16x2xf32> to vector<16x1xf32>
    %c0_1 = arith.constant 0 : index
    %c0_2 = arith.constant 0 : index
    %3 = vector.load %arg3[%c0_1, %c0_2] : memref<16x256xf32, #tpu.memory_space<vmem>>, vector<16x256xf32>
    %4 = vector.broadcast %1 : vector<16x1xf32> to vector<16x256xf32>
    %5 = arith.mulf %3, %4 : vector<16x256xf32>
    %6 = vector.broadcast %2 : vector<16x1xf32> to vector<16x256xf32>
    %7 = arith.addf %5, %6 : vector<16x256xf32>
    %c0_3 = arith.constant 0 : index
    %c0_4 = arith.constant 0 : index
    %8 = vector.load %arg4[%c0_3, %c0_4] : memref<16x256xf32, #tpu.memory_space<vmem>>, vector<16x256xf32>
    tpu.vector_store %arg4[%c0_3, %c0_4], %7 {strides = array<i32>} : memref<16x256xf32, #tpu.memory_space<vmem>>, vector<16x256xf32>,
    return
  }
  func.func @transform_0(%arg0: i32, %arg1: i32) -> (i32, i32) {
    %c0_i32 = arith.constant 0 : i32
    %c0_i32_0 = arith.constant 0 : i32
    return %arg0, %c0_i32 : i32, i32
  }
  func.func @transform_1(%arg0: i32, %arg1: i32) -> (i32, i32) {
    %c0_i32 = arith.constant 0 : i32
    return %arg0, %arg1 : i32, i32
  }
  func.func @transform_2(%arg0: i32, %arg1: i32) -> (i32, i32) {
    %c0_i32 = arith.constant 0 : i32
    return %arg0, %arg1 : i32, i32
  }
}

</mosaic_0001>

<bundles_post_ra>
// kernel: tpu_custom_call.1
= control target key start
LH: loop header
LB: loop body
LE: loop exit
PB: predicated region body
PF: predicated region fallthrough
CT: control target
= control target key end

     0   :  { %7 = vsyncpa [#allocation3], 0  ;;  %s193_s0 = inlined_call_operand.vmem [shape: f32[16,2], index: 0, kind: input, shape index: {}]   ;;  %s194_s1 = inlined_call_operand.hbm [shape: f32[16,256], index: 1, kind: input, shape index: {}]   ;;  %s195_s2 = inlined_call_operand.hbm [shape: f32[16,256], index: 2, kind: output, shape index: {}]  }
   0x1   :  { %8 = vsyncpa [#allocation4], 0  ;;  %s136_s9 = smov [#allocation2]   ;;  %s88_s13 = scalar_lea.hbm %s194_s1, 512 }
   0x2   :  { %s16_s10 = sshll.u32 %s136_s9, 4  ;;  %p89_p0 = scmp.ne.s32.totalorder %s194_s1, %s88_s13  ;;  %s17_s10 = int_to_ptr.vmem [resolvable:$true] %s16_s10 }
   0x3   :  { %p92_p1 = scmp.lt.u32.totalorder %s88_s13, %s194_s1 }
   0x5   :  { %p94_p2 = pnand %p92_p1, %p89_p0 }
   0x7   :  { %97 = shalt.err (!%p94_p2)
}
   0x8   :  { %s98_s18 = scalar_lea.vmem %s17_s10, 512  ;;  %p103_p4 = scmp.lt.s32.totalorder %s17_s10, %s17_s10 }
   0x9   :  { %p99_p3 = scmp.ne.s32.totalorder %s17_s10, %s98_s18  ;;  %p104_p5 = scmp.lt.s32.totalorder %s98_s18, %s98_s18 }
   0xb   :  { %p105_p6 = por %p104_p5, %p103_p4 }
   0xd   :  { %p106_p7 = pnand %p105_p6, %p99_p3 }
   0xf   :  { %109 = shalt.err (!%p106_p7)
}
  0x10   :  { %s137_s19 = smov 256   ;;  %s138_s20 = smov 16  }
  0x11   :  { %22 = dma.hbm_to_vmem [thread:$0]  %s194_s1, 512, %s17_s10, [#allocation3], %s137_s19, %s137_s19, %s138_s20  }
  0x12   :  { %132 = dma.done.wait [#allocation3], 512  }
  0x13   :  { %133 = vsyncadd [#allocation3], 4294966784  ;;  %v139_v0 = vmov 1   ;;  %v140_v1 = vmov 0   ;;  %v26_v2 = vld [vmem:[%s193_s0] sm:$0xff]  ;;  %v27_v3 = vld [vmem:[%s193_s0 + $0x8] sm:$0xff] }
  0x14   :  { %86 = vset.pattern.permute.xlu1 %v139_v0  ;;  %85 = vset.pattern.permute.xlu0 %v140_v1  ;;  %v28_v4 = vld [vmem:[#allocation2] sm:$0xff]  ;;  %v29_v5 = vld [vmem:[#allocation2 + $0x8] sm:$0xff]  ;;  %v30_v10 = vld [vmem:[#allocation2 + $0x10] sm:$0xff]  ;;  %s141_s1 = smov [#allocation5]  }
  0x15   :  { %47 = vperm.xlu1 %86, %v26_v2   ;;  %34 = vperm.xlu0 %85, %v26_v2   ;;  %v31_v11 = vld [vmem:[#allocation2 + $0x18] sm:$0xff]  ;;  %s67_s27 = sshll.u32 %s141_s1, 4  ;;  %s68_s27 = int_to_ptr.vmem [resolvable:$true] %s67_s27 }
  0x16   :  { %s110_s0 = scalar_lea.vmem %s68_s27, 512  ;;  %p115_p9 = scmp.lt.s32.totalorder %s68_s27, %s68_s27 }
  0x17   :  { %p111_p8 = scmp.ne.s32.totalorder %s68_s27, %s110_s0  ;;  %p116_p10 = scmp.lt.s32.totalorder %s110_s0, %s110_s0 }
  0x19   :  { %51 = vperm.xlu1 %86, %v27_v3   ;;  %39 = vperm.xlu0 %85, %v27_v3   ;;  %p117_p11 = por %p116_p10, %p115_p9 }
  0x1b   :  { %p118_p12 = pnand %p117_p11, %p111_p8 }
  0x1d   :  { %87 = vset.pattern.permute.xlu0 %v139_v0 }
  0x94   :  { %v48_v6 = vpop.permute.xlu1 %47  ;;  %v35_v7 = vpop.permute.xlu0 %34 }
  0x95   :  { %v42_v8 = vmul.f32 %v35_v7, %v28_v4  ;;  %v43_v9 = vmul.f32 %v35_v7, %v29_v5 }
  0x97   :  { %v54_v12 = vadd.f32 %v48_v6, %v42_v8  ;;  %v55_v13 = vadd.f32 %v48_v6, %v43_v9 }
  0x98   :  { %v40_v14 = vpop.permute.xlu0 %39  ;;  %v52_v17 = vpop.permute.xlu1 %51 }
  0x99   :  { %58 = vst [vmem:[#allocation5] sm:$0xff] %v54_v12  ;;  %59 = vst [vmem:[#allocation5 + $0x8] sm:$0xff] %v55_v13  ;;  %v44_v15 = vmul.f32 %v40_v14, %v30_v10  ;;  %v45_v16 = vmul.f32 %v40_v14, %v31_v11 }
  0x9b   :  { %v56_v18 = vadd.f32 %v52_v17, %v44_v15  ;;  %v57_v19 = vadd.f32 %v52_v17, %v45_v16 }
  0x9d   :  { %60 = vst [vmem:[#allocation5 + $0x10] sm:$0xff] %v56_v18  ;;  %61 = vst [vmem:[#allocation5 + $0x18] sm:$0xff] %v57_v19 }
  0x9e   :  { %121 = shalt.err (!%p118_p12)
}
  0x9f   :  { %s122_s30 = scalar_lea.hbm %s195_s2, 512 }
  0xa0   :  { %p123_p13 = scmp.ne.s32.totalorder %s195_s2, %s122_s30  ;;  %p126_p0 = scmp.lt.u32.totalorder %s122_s30, %s195_s2 }
  0xa2   :  { %p128_p1 = pnand %p126_p0, %p123_p13 }
  0xa4   :  { %131 = shalt.err (!%p128_p1)
}
  0xa5   :  { %73 = dma.vmem_to_hbm [thread:$0]  %s68_s27, 512, %s195_s2, [#allocation4], %s137_s19, %s137_s19, %s138_s20  }
  0xa6   :  { %134 = dma.done.wait [#allocation4], 512  }
  0xa7   :  { %135 = vsyncadd [#allocation4], 4294966784 }
  0xa8   :  { %77 = vsyncpa [#allocation3], 1 }
  0xa9   :  { %78 = vsyncpa [#allocation4], 1 }

</bundles_post_ra>
